<compile_context>
chip_gen: v5e
topology: v5e:2x2
jax: 0.10.0
libtpu: 0.0.40
codegen_flags: <defaults>
</compile_context>

<pallas_src>
import jax
import jax.numpy as jnp
from jax.experimental import pallas as pl
from jax.experimental.pallas import tpu as pltpu

_LANE = 128
_SUBLANE = 8
_MAX_BATCH_TILE = 4096          # per review: per-row VMEM cost is tiny, big tiles are fine
_VMEM_CAP_BYTES = 48 << 20      # leave headroom inside v7x's 64 MiB per-TC VMEM


def _round_up(n, m):
    return ((n + m - 1) // m) * m


def _num_tensorcores():
    """Best-effort count of TensorCores sharing one Pallas grid (megacore)."""
    try:
        kind = jax.devices()[0].device_kind.lower()
    except Exception:  # pragma: no cover - defensive
        return 1
    # v7x has 2 TCs per chip; v3/v4 are megacore.  v5e/v6e are single-TC.
    if "v7" in kind or "v4" in kind or "v3" in kind:
        return 2
    return 1


def glove_mlp_kernel(x_ref,
                     w1_ref, b1_ref,
                     w2_ref, b2_ref,
                     w3_ref, b3_ref,
                     w4_ref, b4_ref,
                     o_ref):
    """Fused forward pass for one batch tile.

    All four matmuls hit the MXU with bf16 operands / f32 accumulation; bias add
    and ReLU stay f32 on the VPU; dropout is identity (eval mode).  Hidden and
    output widths are zero-padded to multiples of 128 by the wrapper, so every
    intermediate activation and the output store are lane-dense.
    """
    x = x_ref[...].astype(jnp.bfloat16)

    h = jnp.dot(x, w1_ref[...], preferred_element_type=jnp.float32) + b1_ref[...]
    h = jnp.maximum(h, 0.0)                                   # ReLU; dropout = identity

    h = jnp.dot(h.astype(jnp.bfloat16), w2_ref[...],
                preferred_element_type=jnp.float32) + b2_ref[...]
    h = jnp.maximum(h, 0.0)

    h = jnp.dot(h.astype(jnp.bfloat16), w3_ref[...],
                preferred_element_type=jnp.float32) + b3_ref[...]
    h = jnp.maximum(h, 0.0)

    out = jnp.dot(h.astype(jnp.bfloat16), w4_ref[...],
                  preferred_element_type=jnp.float32) + b4_ref[...]
    o_ref[...] = out.astype(o_ref.dtype)


def _choose_batch_tile(B, n_cores, requested=None, max_tile=_MAX_BATCH_TILE):
    """Pick the largest batch tile (multiple of 8, dividing B, <= max_tile).

    Prefer a tile whose grid length is a multiple of `n_cores` so the parallel
    batch axis splits evenly across TensorCores (v7x); on single-TC chips this
    collapses to a single grid step whenever the whole batch fits the tile cap.
    """
    if requested is not None:
        assert requested % _SUBLANE == 0, "batch_tile must be a multiple of 8"
        assert B % requested == 0, "batch_tile must divide batch"
        return requested
    assert B % _SUBLANE == 0, "batch must be a multiple of 8"

    limit = min(B, max_tile)
    candidates = [t for t in range(_SUBLANE, limit + 1, _SUBLANE) if B % t == 0]
    even_split = [t for t in candidates if (B // t) % n_cores == 0]
    pool = even_split if even_split else candidates
    return max(pool)


def prepare_padded_params(params):
    """Zero-pad hidden/output widths up to multiples of 128; weights -> bf16.

    The input dim (K of layer 1) is left unpadded so the x HBM stream is not
    inflated.  Zero padding is exact: padded output lanes stay 0 through ReLU
    and contribute nothing to the next layer.  No further padding to 256: the
    kernel is memory-bound, not MXU-bound.
    """
    padded = {}
    prev_out_pad = None
    for idx in range(1, 5):
        w = params[f"w{idx}"]
        b = params[f"b{idx}"]
        fan_in, fan_out = w.shape
        out_pad = _round_up(fan_out, _LANE)
        k_pad = fan_in if idx == 1 else prev_out_pad
        wp = jnp.zeros((k_pad, out_pad), jnp.float32).at[:fan_in, :fan_out].set(w)
        bp = jnp.zeros((1, out_pad), jnp.float32).at[:, :fan_out].set(b)
        padded[f"w{idx}"] = wp.astype(jnp.bfloat16)   # bf16 MXU operand
        padded[f"b{idx}"] = bp                        # f32 bias add (exact)
        prev_out_pad = out_pad
    return padded, prev_out_pad                       # last out_pad = padded #classes


def glove_classifier_forward(x, params, *, batch_tile=None, out_dtype=jnp.bfloat16):
    """x: [B, input_dim] float32.  params: dict of [in,out] weights / (1,out) biases.

    out_dtype defaults to bf16 to halve the (padded, dominant) output write
    stream; pass jnp.float32 for full-precision logits.
    """
    B, input_dim = x.shape
    num_classes = params["w4"].shape[1]

    n_cores = _num_tensorcores()
    batch_tile = _choose_batch_tile(B, n_cores, batch_tile)
    padded, classes_pad = prepare_padded_params(params)

    # --- VMEM budget (no double counting) ------------------------------------
    # Streamed tiles are double-buffered by the pipeline; weights/biases have a
    # constant block index but are conservatively budgeted at 2 buffers too.
    out_itemsize = jnp.dtype(out_dtype).itemsize
    weight_bytes = sum(int(v.size) * v.dtype.itemsize for v in padded.values())
    max_width = max(int(padded[f"w{i}"].shape[1]) for i in range(1, 5))
    x_tile_bytes = batch_tile * input_dim * x.dtype.itemsize
    o_tile_bytes = batch_tile * classes_pad * out_itemsize
    act_bytes = batch_tile * max_width * (4 + 2) * 2     # live f32 + bf16 activations
    vmem_needed = (2 * (x_tile_bytes + o_tile_bytes)     # double-buffered streams
                   + 2 * weight_bytes                    # resident operands
                   + act_bytes
                   + (4 << 20))                          # compiler scratch headroom
    vmem_limit = int(min(max(vmem_needed, 16 << 20), _VMEM_CAP_BYTES))

    full = lambda arr: pl.BlockSpec(arr.shape, lambda i: (0, 0))   # VMEM-resident

    out_padded = pl.pallas_call(
        glove_mlp_kernel,
        out_shape=jax.ShapeDtypeStruct((B, classes_pad), out_dtype),
        grid_spec=pltpu.PrefetchScalarGridSpec(
            num_scalar_prefetch=0,
            grid=(B // batch_tile,),
            in_specs=[
                pl.BlockSpec((batch_tile, input_dim), lambda i: (i, 0)),  # x tile
                full(padded["w1"]), full(padded["b1"]),
                full(padded["w2"]), full(padded["b2"]),
                full(padded["w3"]), full(padded["b3"]),
                full(padded["w4"]), full(padded["b4"]),
            ],
            out_specs=pl.BlockSpec((batch_tile, classes_pad), lambda i: (i, 0)),
        ),
        compiler_params=pltpu.CompilerParams(
            dimension_semantics=("parallel",),
            vmem_limit_bytes=vmem_limit),
    )(x,
      padded["w1"], padded["b1"],
      padded["w2"], padded["b2"],
      padded["w3"], padded["b3"],
      padded["w4"], padded["b4"])

    # Strip the lane padding outside the kernel (cheap at these widths; the
    # padded lanes hold exactly 0.0 and must not be consumed directly).
    return out_padded[:, :num_classes]


def init_params(key, input_dim, num_classes, hidden_dim):
    """PyTorch-style init U(-1/sqrt(fan_in), 1/sqrt(fan_in)); weights as [in, out]."""
    dims = [
        (input_dim, hidden_dim),          # input_layer
        (hidden_dim, hidden_dim * 2),     # hidden_layer1
        (hidden_dim * 2, hidden_dim),     # hidden_layer2
        (hidden_dim, num_classes),        # output_layer
    ]
    params = {}
    for idx, (fan_in, fan_out) in enumerate(dims, start=1):
        key, kw, kb = jax.random.split(key, 3)
        bound = 1.0 / jnp.sqrt(jnp.float32(fan_in))
        params[f"w{idx}"] = jax.random.uniform(
            kw, (fan_in, fan_out), jnp.float32, minval=-bound, maxval=bound)
        params[f"b{idx}"] = jax.random.uniform(
            kb, (1, fan_out), jnp.float32, minval=-bound, maxval=bound)
    return params


def reference_forward(x, params):
    """Plain-JAX f32 reference (eval-mode forward) for correctness check."""
    h = jnp.maximum(x @ params["w1"] + params["b1"], 0.0)
    h = jnp.maximum(h @ params["w2"] + params["b2"], 0.0)
    h = jnp.maximum(h @ params["w3"] + params["b3"], 0.0)
    return h @ params["w4"] + params["b4"]


if __name__ == "__main__":
    # Small shapes consistent with the module (GloVe-like embeddings).  With the
    # new tiling policy this runs as a single grid step on v5e/v6e and as a
    # 2-step even split on megacore/v7x.
    BATCH = 256
    INPUT_DIM = 64
    HIDDEN_DIM = 32
    NUM_CLASSES = 4

    key = jax.random.PRNGKey(0)
    key, kx = jax.random.split(key)
    x = jax.random.normal(kx, (BATCH, INPUT_DIM), dtype=jnp.float32)

    params = init_params(key, INPUT_DIM, NUM_CLASSES, HIDDEN_DIM)

    out = glove_classifier_forward(x, params)
    out = jax.block_until_ready(out)

    ref = reference_forward(x, params)
    assert out.shape == (BATCH, NUM_CLASSES)
    max_err = float(jnp.max(jnp.abs(out.astype(jnp.float32) - ref)))
    # bf16 MXU operands + bf16 output store -> loosened tolerance vs f32 reference.
    assert max_err < 5e-2, f"mismatch vs reference: max abs err {max_err}"

    print("KERNEL_OK")
</pallas_src>

<mosaic_0001>
module attributes {stable_mosaic.version = 11 : i64} {
  func.func @glove_mlp_kernel(%arg0: i32, %arg1: memref<256x64xf32, #tpu.memory_space<vmem>>, %arg2: memref<64x128xbf16, #tpu.memory_space<vmem>>, %arg3: memref<1x128xf32, #tpu.memory_space<vmem>>, %arg4: memref<128x128xbf16, #tpu.memory_space<vmem>>, %arg5: memref<1x128xf32, #tpu.memory_space<vmem>>, %arg6: memref<128x128xbf16, #tpu.memory_space<vmem>>, %arg7: memref<1x128xf32, #tpu.memory_space<vmem>>, %arg8: memref<128x128xbf16, #tpu.memory_space<vmem>>, %arg9: memref<1x128xf32, #tpu.memory_space<vmem>>, %arg10: memref<256x128xbf16, #tpu.memory_space<vmem>>) attributes {dimension_semantics = [#tpu.dimension_semantics<parallel>], iteration_bounds = array<i64: 1>, scalar_prefetch = 0 : i64, scratch_operands = 0 : i64, tpu.core_type = #tpu.core_type<tc>, window_params = [{transform_indices = @transform_0, window_bounds = array<i64: 256, 64>}, {pipeline_mode = #tpu.pipeline_mode<synchronous>, transform_indices = @transform_1, window_bounds = array<i64: 64, 128>}, {pipeline_mode = #tpu.pipeline_mode<synchronous>, transform_indices = @transform_2, window_bounds = array<i64: 1, 128>}, {pipeline_mode = #tpu.pipeline_mode<synchronous>, transform_indices = @transform_3, window_bounds = array<i64: 128, 128>}, {pipeline_mode = #tpu.pipeline_mode<synchronous>, transform_indices = @transform_4, window_bounds = array<i64: 1, 128>}, {pipeline_mode = #tpu.pipeline_mode<synchronous>, transform_indices = @transform_5, window_bounds = array<i64: 128, 128>}, {pipeline_mode = #tpu.pipeline_mode<synchronous>, transform_indices = @transform_6, window_bounds = array<i64: 1, 128>}, {pipeline_mode = #tpu.pipeline_mode<synchronous>, transform_indices = @transform_7, window_bounds = array<i64: 128, 128>}, {pipeline_mode = #tpu.pipeline_mode<synchronous>, transform_indices = @transform_8, window_bounds = array<i64: 1, 128>}, {transform_indices = @transform_9, window_bounds = array<i64: 256, 128>}]} {
    %c0 = arith.constant 0 : index
    %c0_0 = arith.constant 0 : index
    %0 = vector.load %arg1[%c0, %c0_0] : memref<256x64xf32, #tpu.memory_space<vmem>>, vector<256x64xf32>
    %1 = arith.truncf %0 : vector<256x64xf32> to vector<256x64xbf16>
    %c0_1 = arith.constant 0 : index
    %c0_2 = arith.constant 0 : index
    %2 = vector.load %arg2[%c0_1, %c0_2] : memref<64x128xbf16, #tpu.memory_space<vmem>>, vector<64x128xbf16>
    %cst = arith.constant dense<0.000000e+00> : vector<256x128xf32>
    %3 = tpu.matmul %1, %2, %cst {dimension_numbers = #tpu.dot_dimension_numbers<[1], [0], [0], [1], [0, 0, 1, 1], [], []>} : vector<256x64xbf16>, vector<64x128xbf16>, vector<256x128xf32> -> vector<256x128xf32>
    %c0_3 = arith.constant 0 : index
    %c0_4 = arith.constant 0 : index
    %4 = vector.load %arg3[%c0_3, %c0_4] : memref<1x128xf32, #tpu.memory_space<vmem>>, vector<1x128xf32>
    %5 = vector.broadcast %4 : vector<1x128xf32> to vector<256x128xf32>
    %6 = arith.addf %3, %5 : vector<256x128xf32>
    %cst_5 = arith.constant 0.000000e+00 : f32
    %7 = vector.broadcast %cst_5 : f32 to vector<256x128xf32>
    %8 = arith.maximumf %6, %7 : vector<256x128xf32>
    %9 = arith.truncf %8 : vector<256x128xf32> to vector<256x128xbf16>
    %c0_6 = arith.constant 0 : index
    %c0_7 = arith.constant 0 : index
    %10 = vector.load %arg4[%c0_6, %c0_7] : memref<128x128xbf16, #tpu.memory_space<vmem>>, vector<128x128xbf16>
    %cst_8 = arith.constant dense<0.000000e+00> : vector<256x128xf32>
    %11 = tpu.matmul %9, %10, %cst_8 {dimension_numbers = #tpu.dot_dimension_numbers<[1], [0], [0], [1], [0, 0, 1, 1], [], []>} : vector<256x128xbf16>, vector<128x128xbf16>, vector<256x128xf32> -> vector<256x128xf32>
    %c0_9 = arith.constant 0 : index
    %c0_10 = arith.constant 0 : index
    %12 = vector.load %arg5[%c0_9, %c0_10] : memref<1x128xf32, #tpu.memory_space<vmem>>, vector<1x128xf32>
    %13 = vector.broadcast %12 : vector<1x128xf32> to vector<256x128xf32>
    %14 = arith.addf %11, %13 : vector<256x128xf32>
    %cst_11 = arith.constant 0.000000e+00 : f32
    %15 = vector.broadcast %cst_11 : f32 to vector<256x128xf32>
    %16 = arith.maximumf %14, %15 : vector<256x128xf32>
    %17 = arith.truncf %16 : vector<256x128xf32> to vector<256x128xbf16>
    %c0_12 = arith.constant 0 : index
    %c0_13 = arith.constant 0 : index
    %18 = vector.load %arg6[%c0_12, %c0_13] : memref<128x128xbf16, #tpu.memory_space<vmem>>, vector<128x128xbf16>
    %cst_14 = arith.constant dense<0.000000e+00> : vector<256x128xf32>
    %19 = tpu.matmul %17, %18, %cst_14 {dimension_numbers = #tpu.dot_dimension_numbers<[1], [0], [0], [1], [0, 0, 1, 1], [], []>} : vector<256x128xbf16>, vector<128x128xbf16>, vector<256x128xf32> -> vector<256x128xf32>
    %c0_15 = arith.constant 0 : index
    %c0_16 = arith.constant 0 : index
    %20 = vector.load %arg7[%c0_15, %c0_16] : memref<1x128xf32, #tpu.memory_space<vmem>>, vector<1x128xf32>
    %21 = vector.broadcast %20 : vector<1x128xf32> to vector<256x128xf32>
    %22 = arith.addf %19, %21 : vector<256x128xf32>
    %cst_17 = arith.constant 0.000000e+00 : f32
    %23 = vector.broadcast %cst_17 : f32 to vector<256x128xf32>
    %24 = arith.maximumf %22, %23 : vector<256x128xf32>
    %25 = arith.truncf %24 : vector<256x128xf32> to vector<256x128xbf16>
    %c0_18 = arith.constant 0 : index
    %c0_19 = arith.constant 0 : index
    %26 = vector.load %arg8[%c0_18, %c0_19] : memref<128x128xbf16, #tpu.memory_space<vmem>>, vector<128x128xbf16>
    %cst_20 = arith.constant dense<0.000000e+00> : vector<256x128xf32>
    %27 = tpu.matmul %25, %26, %cst_20 {dimension_numbers = #tpu.dot_dimension_numbers<[1], [0], [0], [1], [0, 0, 1, 1], [], []>} : vector<256x128xbf16>, vector<128x128xbf16>, vector<256x128xf32> -> vector<256x128xf32>
    %c0_21 = arith.constant 0 : index
    %c0_22 = arith.constant 0 : index
    %28 = vector.load %arg9[%c0_21, %c0_22] : memref<1x128xf32, #tpu.memory_space<vmem>>, vector<1x128xf32>
    %29 = vector.broadcast %28 : vector<1x128xf32> to vector<256x128xf32>
    %30 = arith.addf %27, %29 : vector<256x128xf32>
    %31 = arith.truncf %30 : vector<256x128xf32> to vector<256x128xbf16>
    %c0_23 = arith.constant 0 : index
    %c0_24 = arith.constant 0 : index
    %32 = vector.load %arg10[%c0_23, %c0_24] : memref<256x128xbf16, #tpu.memory_space<vmem>>, vector<256x128xbf16>
    tpu.vector_store %arg10[%c0_23, %c0_24], %31 {strides = array<i32>} : memref<256x128xbf16, #tpu.memory_space<vmem>>, vector<256x128xbf16>,
    return
  }
  func.func @transform_0(%arg0: i32) -> (i32, i32) {
    %c0_i32 = arith.constant 0 : i32
    %c0_i32_0 = arith.constant 0 : i32
    return %arg0, %c0_i32 : i32, i32
  }
  func.func @transform_1(%arg0: i32) -> (i32, i32) {
    %c0_i32 = arith.constant 0 : i32
    %c0_i32_0 = arith.constant 0 : i32
    %c0_i32_1 = arith.constant 0 : i32
    return %c0_i32, %c0_i32_0 : i32, i32
  }
  func.func @transform_2(%arg0: i32) -> (i32, i32) {
    %c0_i32 = arith.constant 0 : i32
    %c0_i32_0 = arith.constant 0 : i32
    %c0_i32_1 = arith.constant 0 : i32
    return %c0_i32, %c0_i32_0 : i32, i32
  }
  func.func @transform_3(%arg0: i32) -> (i32, i32) {
    %c0_i32 = arith.constant 0 : i32
    %c0_i32_0 = arith.constant 0 : i32
    %c0_i32_1 = arith.constant 0 : i32
    return %c0_i32, %c0_i32_0 : i32, i32
  }
  func.func @transform_4(%arg0: i32) -> (i32, i32) {
    %c0_i32 = arith.constant 0 : i32
    %c0_i32_0 = arith.constant 0 : i32
    %c0_i32_1 = arith.constant 0 : i32
    return %c0_i32, %c0_i32_0 : i32, i32
  }
  func.func @transform_5(%arg0: i32) -> (i32, i32) {
    %c0_i32 = arith.constant 0 : i32
    %c0_i32_0 = arith.constant 0 : i32
    %c0_i32_1 = arith.constant 0 : i32
    return %c0_i32, %c0_i32_0 : i32, i32
  }
  func.func @transform_6(%arg0: i32) -> (i32, i32) {
    %c0_i32 = arith.constant 0 : i32
    %c0_i32_0 = arith.constant 0 : i32
    %c0_i32_1 = arith.constant 0 : i32
    return %c0_i32, %c0_i32_0 : i32, i32
  }
  func.func @transform_7(%arg0: i32) -> (i32, i32) {
    %c0_i32 = arith.constant 0 : i32
    %c0_i32_0 = arith.constant 0 : i32
    %c0_i32_1 = arith.constant 0 : i32
    return %c0_i32, %c0_i32_0 : i32, i32
  }
  func.func @transform_8(%arg0: i32) -> (i32, i32) {
    %c0_i32 = arith.constant 0 : i32
    %c0_i32_0 = arith.constant 0 : i32
    %c0_i32_1 = arith.constant 0 : i32
    return %c0_i32, %c0_i32_0 : i32, i32
  }
  func.func @transform_9(%arg0: i32) -> (i32, i32) {
    %c0_i32 = arith.constant 0 : i32
    %c0_i32_0 = arith.constant 0 : i32
    return %arg0, %c0_i32 : i32, i32
  }
}

</mosaic_0001>

<bundles_post_ra>
// kernel: tpu_custom_call.1
= control target key start
LH: loop header
LB: loop body
LE: loop exit
PB: predicated region body
PF: predicated region fallthrough
CT: control target
= control target key end

     0   :  { %s1637_s0 = inlined_call_operand.vmem [shape: f32[256,64], index: 0, kind: input, shape index: {}]   ;;  %s1638_s1 = inlined_call_operand.vmem [shape: bf16[64,128], index: 1, kind: input, shape index: {}]   ;;  %s1639_s2 = inlined_call_operand.vmem [shape: f32[1,128], index: 2, kind: input, shape index: {}]   ;;  %s1640_s3 = inlined_call_operand.vmem [shape: bf16[128,128], index: 3, kind: input, shape index: {}]   ;;  %s1641_s4 = inlined_call_operand.vmem [shape: f32[1,128], index: 4, kind: input, shape index: {}]   ;;  %s1642_s5 = inlined_call_operand.vmem [shape: bf16[128,128], index: 5, kind: input, shape index: {}]   ;;  %s1643_s6 = inlined_call_operand.vmem [shape: f32[1,128], index: 6, kind: input, shape index: {}]   ;;  %s1644_s7 = inlined_call_operand.vmem [shape: bf16[128,128], index: 7, kind: input, shape index: {}]   ;;  %s1645_s8 = inlined_call_operand.vmem [shape: f32[1,128], index: 8, kind: input, shape index: {}]   ;;  %s1646_s9 = inlined_call_operand.hbm [shape: bf16[256,128], index: 9, kind: output, shape index: {}]  }
   0x1   :  { %v1084_v0 = vld [vmem:[%s1638_s1 + $0x18] sm:$0xff]  ;;  %v1083_v1 = vld [vmem:[%s1638_s1 + $0x10] sm:$0xff] }
   0x2   :  { %171 = vmatpush.bf16.msra.mxu0 %v1084_v0 }
   0x3   :  { %14 = vsyncpa [#allocation3], 0  ;;  %v1082_v2 = vld [vmem:[%s1638_s1 + $0x8] sm:$0xff]  ;;  %v1081_v3 = vld [vmem:[%s1638_s1] sm:$0xff]  ;;  %vm118_vm0 = vcmask 523264   ;;  %s941_s19 = sshll.u32 %s1646_s9, 4  ;;  %s942_s19 = int_to_ptr.hbm [resolvable:$true] %s941_s19 }
   0x4   :  { %v34_v4 = vld [vmem:[%s1637_s0] sm:$0xff]  ;;  %v35_v5 = vld [vmem:[%s1637_s0 + $0x8] sm:$0xff]  ;;  %v36_v7 = vld [vmem:[%s1637_s0 + $0x10] sm:$0xff]  ;;  %s1238_s20 = smov 64   ;;  %s1239_s21 = smov 4  }
   0x5   :  { %v66_v6 = vpack.c.bf16 %v35_v5, %v34_v4  ;;  %v37_v8 = vld [vmem:[%s1637_s0 + $0x18] sm:$0xff]  ;;  %v38_v10 = vld [vmem:[%s1637_s0 + $0x20] sm:$0xff]  ;;  %v39_v11 = vld [vmem:[%s1637_s0 + $0x28] sm:$0xff] }
   0x6   :  { %172 = vmatpush.bf16.msra.mxu0 %v1083_v1  ;;  %v67_v9 = vpack.c.bf16 %v37_v8, %v36_v7  ;;  %v68_v12 = vpack.c.bf16 %v39_v11, %v38_v10  ;;  %v40_v13 = vld [vmem:[%s1637_s0 + $0x30] sm:$0xff]  ;;  %v41_v14 = vld [vmem:[%s1637_s0 + $0x38] sm:$0xff]  ;;  %v42_v16 = vld [vmem:[%s1637_s0 + $0x40] sm:$0xff] }
   0x7   :  { %v69_v15 = vpack.c.bf16 %v41_v14, %v40_v13  ;;  %v43_v17 = vld [vmem:[%s1637_s0 + $0x48] sm:$0xff]  ;;  %v1092_v19 = vld [vmem:[%s1640_s3 + $0x38] sm:$0xff]  ;;  %v44_v20 = vld [vmem:[%s1637_s0 + $0x50] sm:$0xff] }
   0x8   :  { %v70_v18 = vpack.c.bf16 %v43_v17, %v42_v16  ;;  %372 = vmatpush.bf16.msra.mxu1 %v1092_v19  ;;  %v45_v21 = vld [vmem:[%s1637_s0 + $0x58] sm:$0xff]  ;;  %v1091_v23 = vld [vmem:[%s1640_s3 + $0x30] sm:$0xff]  ;;  %v1090_v24 = vld [vmem:[%s1640_s3 + $0x28] sm:$0xff] }
   0x9   :  { %v71_v22 = vpack.c.bf16 %v45_v21, %v44_v20  ;;  %v1089_v25 = vld [vmem:[%s1640_s3 + $0x20] sm:$0xff]  ;;  %v47_v27 = vld [vmem:[%s1637_s0 + $0x68] sm:$0xff]  ;;  %v1088_v28 = vld [vmem:[%s1640_s3 + $0x18] sm:$0xff] }
   0xa   :  { %173 = vmatpush.bf16.msra.mxu0 %v1082_v2  ;;  %v46_v26 = vld [vmem:[%s1637_s0 + $0x60] sm:$0xff]  ;;  %v1087_v30 = vld [vmem:[%s1640_s3 + $0x10] sm:$0xff]  ;;  %v1086_v31 = vld [vmem:[%s1640_s3 + $0x8] sm:$0xff] }
   0xb   :  { %v72_v29 = vpack.c.bf16 %v47_v27, %v46_v26  ;;  %v1085_v32 = vld [vmem:[%s1640_s3] sm:$0xff]  ;;  %v48_v33 = vld [vmem:[%s1637_s0 + $0x70] sm:$0xff]  ;;  %v49_v34 = vld [vmem:[%s1637_s0 + $0x78] sm:$0xff] }
   0xc   :  { %373 = vmatpush.bf16.msra.mxu1 %v1091_v23  ;;  %v73_v35 = vpack.c.bf16 %v49_v34, %v48_v33  ;;  %v50_v36 = vld [vmem:[%s1637_s0 + $0x80] sm:$0xff]  ;;  %v51_v37 = vld [vmem:[%s1637_s0 + $0x88] sm:$0xff]  ;;  %v52_v46 = vld [vmem:[%s1637_s0 + $0x90] sm:$0xff] }
   0xd   :  { %v74_v38 = vpack.c.bf16 %v51_v37, %v50_v36  ;;  %v1391_v40 = vld [vmem:[%s1639_s2] ss:$0 sm:$0xff]  ;;  %v53_v47 = vld [vmem:[%s1637_s0 + $0x98] sm:$0xff]  ;;  %v55_v57 = vld [vmem:[%s1637_s0 + $0xa8] sm:$0xff] }
   0xe   :  { %174 = vmatpush.bf16.msra.mxu0 %v1081_v3  ;;  %v75_v49 = vpack.c.bf16 %v53_v47, %v52_v46  ;;  %v54_v56 = vld [vmem:[%s1637_s0 + $0xa0] sm:$0xff]  ;;  %v56_v2 = vld [vmem:[%s1637_s0 + $0xb0] sm:$0xff]  ;;  %v57_v3 = vld [vmem:[%s1637_s0 + $0xb8] sm:$0xff] }
   0xf   :  { %v76_v59 = vpack.c.bf16 %v55_v57, %v54_v56  ;;  %v77_v5 = vpack.c.bf16 %v57_v3, %v56_v2  ;;  %v59_v13 = vld [vmem:[%s1637_s0 + $0xc8] sm:$0xff]  ;;  %v61_v23 = vld [vmem:[%s1637_s0 + $0xd8] sm:$0xff]  ;;  %v62_v33 = vld [vmem:[%s1637_s0 + $0xe0] sm:$0xff] }
  0x10   :  { %374 = vmatpush.bf16.msra.mxu1 %v1090_v24  ;;  %v63_v34 = vld [vmem:[%s1637_s0 + $0xe8] sm:$0xff]  ;;  %v1099_v36 = vld [vmem:[%s1642_s5 + $0x30] sm:$0xff] }
  0x11   :  { %969 = vmatmul.msk.bf16.vlgmr.msra.gmra.mxu0 %vm118_vm0, %v66_v6  ;;  %v80_v37 = vpack.c.bf16 %v63_v34, %v62_v33 }
  0x14   :  { %375 = vmatpush.bf16.msra.mxu1 %v1089_v25 }
  0x18   :  { %376 = vmatpush.bf16.msra.mxu1 %v1088_v28 }
  0x1c   :  { %377 = vmatpush.bf16.msra.mxu1 %v1087_v30  ;;  %v1100_v30 = vld [vmem:[%s1642_s5 + $0x38] sm:$0xff] }
  0x1d   :  { %577 = vmatpush.bf16.msra.mxu2 %v1100_v30 }
  0x20   :  { %378 = vmatpush.bf16.msra.mxu1 %v1086_v31 }
  0x21   :  { %970 = vmatmul.msk.bf16.gmra.mxu0 %vm118_vm0, %v67_v9  ;;  %578 = vmatpush.bf16.msra.mxu2 %v1099_v36 }
  0x24   :  { %379 = vmatpush.bf16.msra.mxu1 %v1085_v32 }
  0x31   :  { %971 = vmatmul.msk.bf16.gmra.mxu0 %vm118_vm0, %v68_v12  ;;  %v58_v12 = vld [vmem:[%s1637_s0 + $0xc0] sm:$0xff] }
  0x41   :  { %972 = vmatmul.msk.bf16.gmra.mxu0 %vm118_vm0, %v69_v15  ;;  %v78_v15 = vpack.c.bf16 %v59_v13, %v58_v12 }
  0x51   :  { %973 = vmatmul.msk.bf16.gmra.mxu0 %vm118_vm0, %v70_v18 }
  0x61   :  { %974 = vmatmul.msk.bf16.gmra.mxu0 %vm118_vm0, %v71_v22  ;;  %v60_v22 = vld [vmem:[%s1637_s0 + $0xd0] sm:$0xff] }
  0x62   :  { %v79_v25 = vpack.c.bf16 %v61_v23, %v60_v22 }
  0x71   :  { %975 = vmatmul.msk.bf16.gmra.mxu0 %vm118_vm0, %v72_v29 }
  0x81   :  { %976 = vmatmul.msk.bf16.gmra.mxu0 %vm118_vm0, %v73_v35 }
  0x8e   :  { %v176_v39 = vpop.f32.mrf.mxu0 }
  0x8f   :  { %v177_v41 = vadd.f32 %v1391_v40, %v176_v39  ;;  %v1098_v39 = vld [vmem:[%s1642_s5 + $0x28] sm:$0xff] }
  0x90   :  { %579 = vmatpush.bf16.msra.mxu2 %v1098_v39 }
  0x91   :  { %977 = vmatmul.msk.bf16.gmra.mxu0 %vm118_vm0, %v74_v38  ;;  %v256_v44 = vmax.f32 %v177_v41, 0.0  ;;  %v1097_v41 = vld [vmem:[%s1642_s5 + $0x20] sm:$0xff] }
  0x94   :  { %580 = vmatpush.bf16.msra.mxu2 %v1097_v41 }
  0x96   :  { %v178_v42 = vpop.f32.mrf.mxu0 }
  0x97   :  { %v179_v43 = vadd.f32 %v1391_v40, %v178_v42 }
  0x99   :  { %v257_v45 = vmax.f32 %v179_v43, 0.0 }
  0x9b   :  { %v288_v48 = vpack.c.bf16 %v257_v45, %v256_v44  ;;  %v1096_v45 = vld [vmem:[%s1642_s5 + $0x18] sm:$0xff] }
  0x9c   :  { %581 = vmatpush.bf16.msra.mxu2 %v1096_v45 }
  0x9d   :  { %380 = vmatmul.bf16.vlgmr.msra.gmra.mxu1 %v288_v48  ;;  %v64_v48 = vld [vmem:[%s1637_s0 + $0xf0] sm:$0xff] }
  0x9e   :  { %v181_v50 = vpop.f32.mrf.mxu0 }
  0x9f   :  { %v182_v51 = vadd.f32 %v1391_v40, %v181_v50 }
  0xa1   :  { %978 = vmatmul.msk.bf16.gmra.mxu0 %vm118_vm0, %v75_v49  ;;  %v258_v54 = vmax.f32 %v182_v51, 0.0  ;;  %v65_v49 = vld [vmem:[%s1637_s0 + $0xf8] sm:$0xff]  ;;  %v1095_v51 = vld [vmem:[%s1642_s5 + $0x10] sm:$0xff] }
  0xa2   :  { %582 = vmatpush.bf16.msra.mxu2 %v1095_v51 }
  0xa6   :  { %v183_v52 = vpop.f32.mrf.mxu0 }
  0xa7   :  { %v184_v53 = vadd.f32 %v1391_v40, %v183_v52  ;;  %v81_v52 = vpack.c.bf16 %v65_v49, %v64_v48 }
  0xa9   :  { %v259_v55 = vmax.f32 %v184_v53, 0.0 }
  0xab   :  { %v289_v58 = vpack.c.bf16 %v259_v55, %v258_v54  ;;  %v1094_v54 = vld [vmem:[%s1642_s5 + $0x8] sm:$0xff]  ;;  %v1093_v55 = vld [vmem:[%s1642_s5] sm:$0xff] }
  0xac   :  { %583 = vmatpush.bf16.msra.mxu2 %v1094_v54 }
  0xad   :  { %385 = vmatmul.bf16.gmra.mxu1 %v289_v58 }
  0xae   :  { %v186_v60 = vpop.f32.mrf.mxu0 }
  0xaf   :  { %v187_v61 = vadd.f32 %v1391_v40, %v186_v60 }
  0xb0   :  { %584 = vmatpush.bf16.msra.mxu2 %v1093_v55 }
  0xb1   :  { %979 = vmatmul.msk.bf16.gmra.mxu0 %vm118_vm0, %v76_v59  ;;  %v260_v0 = vmax.f32 %v187_v61, 0.0 }
  0xb6   :  { %v188_v62 = vpop.f32.mrf.mxu0 }
  0xb7   :  { %v189_v63 = vadd.f32 %v1391_v40, %v188_v62 }
  0xb9   :  { %v261_v1 = vmax.f32 %v189_v63, 0.0 }
  0xbb   :  { %v290_v4 = vpack.c.bf16 %v261_v1, %v260_v0 }
  0xbd   :  { %390 = vmatmul.bf16.gmra.mxu1 %v290_v4 }
  0xbe   :  { %v191_v6 = vpop.f32.mrf.mxu0 }
  0xbf   :  { %v192_v7 = vadd.f32 %v1391_v40, %v191_v6  ;;  %v1488_v6 = vld [vmem:[%s1641_s4] ss:$0 sm:$0xff] }
  0xc1   :  { %980 = vmatmul.msk.bf16.gmra.mxu0 %vm118_vm0, %v77_v5  ;;  %v262_v10 = vmax.f32 %v192_v7, 0.0 }
  0xc6   :  { %v193_v8 = vpop.f32.mrf.mxu0 }
  0xc7   :  { %v194_v9 = vadd.f32 %v1391_v40, %v193_v8 }
  0xc9   :  { %v263_v11 = vmax.f32 %v194_v9, 0.0 }
  0xcb   :  { %v291_v14 = vpack.c.bf16 %v263_v11, %v262_v10 }
  0xcd   :  { %395 = vmatmul.bf16.gmra.mxu1 %v291_v14 }
  0xce   :  { %v196_v16 = vpop.f32.mrf.mxu0 }
  0xcf   :  { %v197_v17 = vadd.f32 %v1391_v40, %v196_v16 }
  0xd1   :  { %981 = vmatmul.msk.bf16.gmra.mxu0 %vm118_vm0, %v78_v15  ;;  %v264_v20 = vmax.f32 %v197_v17, 0.0 }
  0xd6   :  { %v198_v18 = vpop.f32.mrf.mxu0 }
  0xd7   :  { %v199_v19 = vadd.f32 %v1391_v40, %v198_v18 }
  0xd9   :  { %v265_v21 = vmax.f32 %v199_v19, 0.0 }
  0xdb   :  { %v292_v24 = vpack.c.bf16 %v265_v21, %v264_v20 }
  0xdd   :  { %400 = vmatmul.bf16.gmra.mxu1 %v292_v24 }
  0xde   :  { %v201_v26 = vpop.f32.mrf.mxu0 }
  0xdf   :  { %v202_v27 = vadd.f32 %v1391_v40, %v201_v26 }
  0xe1   :  { %982 = vmatmul.msk.bf16.gmra.mxu0 %vm118_vm0, %v79_v25  ;;  %v266_v31 = vmax.f32 %v202_v27, 0.0 }
  0xe6   :  { %v203_v28 = vpop.f32.mrf.mxu0 }
  0xe7   :  { %v204_v29 = vadd.f32 %v1391_v40, %v203_v28 }
  0xe9   :  { %v267_v32 = vmax.f32 %v204_v29, 0.0 }
  0xeb   :  { %v293_v35 = vpack.c.bf16 %v267_v32, %v266_v31 }
  0xed   :  { %405 = vmatmul.bf16.gmra.mxu1 %v293_v35 }
  0xee   :  { %v206_v38 = vpop.f32.mrf.mxu0 }
  0xef   :  { %v207_v42 = vadd.f32 %v1391_v40, %v206_v38 }
  0xf1   :  { %983 = vmatmul.msk.bf16.gmra.mxu0 %vm118_vm0, %v80_v37  ;;  %v268_v46 = vmax.f32 %v207_v42, 0.0 }
  0xf6   :  { %v208_v43 = vpop.f32.mrf.mxu0 }
  0xf7   :  { %v209_v44 = vadd.f32 %v1391_v40, %v208_v43 }
  0xf9   :  { %v269_v47 = vmax.f32 %v209_v44, 0.0 }
  0xfb   :  { %v294_v50 = vpack.c.bf16 %v269_v47, %v268_v46 }
  0xfd   :  { %410 = vmatmul.bf16.gmra.mxu1 %v294_v50 }
  0xfe   :  { %v211_v53 = vpop.f32.mrf.mxu0 }
  0xff   :  { %v212_v56 = vadd.f32 %v1391_v40, %v211_v53 }
 0x101   :  { %984 = vmatmul.msk.bf16.gmra.mxu0 %vm118_vm0, %v81_v52  ;;  %v270_v59 = vmax.f32 %v212_v56, 0.0 }
 0x106   :  { %v213_v57 = vpop.f32.mrf.mxu0 }
 0x107   :  { %v214_v58 = vadd.f32 %v1391_v40, %v213_v57 }
 0x109   :  { %v271_v60 = vmax.f32 %v214_v58, 0.0 }
 0x10b   :  { %v295_v61 = vpack.c.bf16 %v271_v60, %v270_v59 }
 0x10d   :  { %415 = vmatmul.bf16.gmra.mxu1 %v295_v61 }
 0x10e   :  { %v216_v62 = vpop.f32.mrf.mxu0 }
 0x10f   :  { %v217_v63 = vadd.f32 %v1391_v40, %v216_v62 }
 0x111   :  { %v272_v2 = vmax.f32 %v217_v63, 0.0 }
 0x116   :  { %v218_v0 = vpop.f32.mrf.mxu0 }
 0x117   :  { %v219_v1 = vadd.f32 %v1391_v40, %v218_v0 }
 0x119   :  { %v273_v3 = vmax.f32 %v219_v1, 0.0 }
 0x11a   :  { %v381_v4 = vpop.f32.mrf.mxu1 }
 0x11b   :  { %v296_v5 = vpack.c.bf16 %v273_v3, %v272_v2  ;;  %v382_v8 = vadd.f32 %v1488_v6, %v381_v4 }
 0x11d   :  { %420 = vmatmul.bf16.gmra.mxu1 %v296_v5  ;;  %v461_v11 = vmax.f32 %v382_v8, 0.0 }
 0x11e   :  { %v221_v7 = vpop.f32.mrf.mxu0 }
 0x11f   :  { %v222_v12 = vadd.f32 %v1391_v40, %v221_v7 }
 0x121   :  { %v274_v17 = vmax.f32 %v222_v12, 0.0 }
 0x122   :  { %v383_v9 = vpop.f32.mrf.mxu1 }
 0x123   :  { %v384_v10 = vadd.f32 %v1488_v6, %v383_v9 }
 0x125   :  { %v462_v13 = vmax.f32 %v384_v10, 0.0 }
 0x126   :  { %v223_v14 = vpop.f32.mrf.mxu0 }
 0x127   :  { %v224_v15 = vadd.f32 %v1391_v40, %v223_v14  ;;  %v493_v16 = vpack.c.bf16 %v462_v13, %v461_v11 }
 0x129   :  { %v275_v18 = vmax.f32 %v224_v15, 0.0  ;;  %585 = vmatmul.bf16.vlgmr.msra.gmra.mxu2 %v493_v16 }
 0x12a   :  { %v386_v19 = vpop.f32.mrf.mxu1 }
 0x12b   :  { %v297_v20 = vpack.c.bf16 %v275_v18, %v274_v17  ;;  %v387_v22 = vadd.f32 %v1488_v6, %v386_v19 }
 0x12d   :  { %425 = vmatmul.bf16.gmra.mxu1 %v297_v20  ;;  %v463_v25 = vmax.f32 %v387_v22, 0.0 }
 0x12e   :  { %v226_v21 = vpop.f32.mrf.mxu0 }
 0x12f   :  { %v227_v26 = vadd.f32 %v1391_v40, %v226_v21 }
 0x131   :  { %v276_v31 = vmax.f32 %v227_v26, 0.0 }
 0x132   :  { %v388_v23 = vpop.f32.mrf.mxu1 }
 0x133   :  { %v389_v24 = vadd.f32 %v1488_v6, %v388_v23 }
 0x135   :  { %v464_v27 = vmax.f32 %v389_v24, 0.0 }
 0x136   :  { %v228_v28 = vpop.f32.mrf.mxu0 }
 0x137   :  { %v229_v29 = vadd.f32 %v1391_v40, %v228_v28  ;;  %v494_v30 = vpack.c.bf16 %v464_v27, %v463_v25  ;;  %v1108_v28 = vld [vmem:[%s1644_s7 + $0x38] sm:$0xff] }
 0x138   :  { %782 = vmatpush.bf16.msra.mxu3 %v1108_v28 }
 0x139   :  { %v277_v32 = vmax.f32 %v229_v29, 0.0  ;;  %590 = vmatmul.bf16.gmra.mxu2 %v494_v30  ;;  %v1107_v30 = vld [vmem:[%s1644_s7 + $0x30] sm:$0xff] }
 0x13a   :  { %v391_v33 = vpop.f32.mrf.mxu1 }
 0x13b   :  { %v298_v34 = vpack.c.bf16 %v277_v32, %v276_v31  ;;  %v392_v36 = vadd.f32 %v1488_v6, %v391_v33 }
 0x13c   :  { %783 = vmatpush.bf16.msra.mxu3 %v1107_v30 }
 0x13d   :  { %430 = vmatmul.bf16.gmra.mxu1 %v298_v34  ;;  %v465_v39 = vmax.f32 %v392_v36, 0.0  ;;  %v1106_v34 = vld [vmem:[%s1644_s7 + $0x28] sm:$0xff] }
 0x13e   :  { %v231_v35 = vpop.f32.mrf.mxu0 }
 0x13f   :  { %v232_v41 = vadd.f32 %v1391_v40, %v231_v35 }
 0x140   :  { %784 = vmatpush.bf16.msra.mxu3 %v1106_v34 }
 0x141   :  { %v278_v46 = vmax.f32 %v232_v41, 0.0 }
 0x142   :  { %v393_v37 = vpop.f32.mrf.mxu1 }
 0x143   :  { %v394_v38 = vadd.f32 %v1488_v6, %v393_v37 }
 0x145   :  { %v466_v42 = vmax.f32 %v394_v38, 0.0 }
 0x146   :  { %v233_v43 = vpop.f32.mrf.mxu0 }
 0x147   :  { %v234_v44 = vadd.f32 %v1391_v40, %v233_v43  ;;  %v495_v45 = vpack.c.bf16 %v466_v42, %v465_v39  ;;  %v1105_v39 = vld [vmem:[%s1644_s7 + $0x20] sm:$0xff] }
 0x148   :  { %785 = vmatpush.bf16.msra.mxu3 %v1105_v39 }
 0x149   :  { %v279_v47 = vmax.f32 %v234_v44, 0.0  ;;  %595 = vmatmul.bf16.gmra.mxu2 %v495_v45 }
 0x14a   :  { %v396_v48 = vpop.f32.mrf.mxu1 }
 0x14b   :  { %v299_v49 = vpack.c.bf16 %v279_v47, %v278_v46  ;;  %v397_v51 = vadd.f32 %v1488_v6, %v396_v48  ;;  %v1104_v47 = vld [vmem:[%s1644_s7 + $0x18] sm:$0xff] }
 0x14c   :  { %786 = vmatpush.bf16.msra.mxu3 %v1104_v47 }
 0x14d   :  { %435 = vmatmul.bf16.gmra.mxu1 %v299_v49  ;;  %v467_v54 = vmax.f32 %v397_v51, 0.0  ;;  %v1103_v49 = vld [vmem:[%s1644_s7 + $0x10] sm:$0xff]  ;;  %v1102_v51 = vld [vmem:[%s1644_s7 + $0x8] sm:$0xff] }
 0x14e   :  { %v236_v50 = vpop.f32.mrf.mxu0 }
 0x14f   :  { %v237_v55 = vadd.f32 %v1391_v40, %v236_v50 }
 0x150   :  { %787 = vmatpush.bf16.msra.mxu3 %v1103_v49 }
 0x151   :  { %v280_v60 = vmax.f32 %v237_v55, 0.0  ;;  %v1101_v55 = vld [vmem:[%s1644_s7] sm:$0xff] }
 0x152   :  { %v398_v52 = vpop.f32.mrf.mxu1 }
 0x153   :  { %v399_v53 = vadd.f32 %v1488_v6, %v398_v52 }
 0x154   :  { %788 = vmatpush.bf16.msra.mxu3 %v1102_v51 }
 0x155   :  { %v468_v56 = vmax.f32 %v399_v53, 0.0 }
 0x156   :  { %v238_v57 = vpop.f32.mrf.mxu0 }
 0x157   :  { %v239_v58 = vadd.f32 %v1391_v40, %v238_v57  ;;  %v496_v59 = vpack.c.bf16 %v468_v56, %v467_v54 }
 0x158   :  { %789 = vmatpush.bf16.msra.mxu3 %v1101_v55 }
 0x159   :  { %v281_v61 = vmax.f32 %v239_v58, 0.0  ;;  %600 = vmatmul.bf16.gmra.mxu2 %v496_v59 }
 0x15a   :  { %v401_v62 = vpop.f32.mrf.mxu1 }
 0x15b   :  { %v300_v63 = vpack.c.bf16 %v281_v61, %v280_v60  ;;  %v402_v1 = vadd.f32 %v1488_v6, %v401_v62 }
 0x15d   :  { %440 = vmatmul.bf16.gmra.mxu1 %v300_v63  ;;  %v469_v4 = vmax.f32 %v402_v1, 0.0 }
 0x15e   :  { %v241_v0 = vpop.f32.mrf.mxu0 }
 0x15f   :  { %v242_v5 = vadd.f32 %v1391_v40, %v241_v0 }
 0x161   :  { %v282_v11 = vmax.f32 %v242_v5, 0.0 }
 0x162   :  { %v403_v2 = vpop.f32.mrf.mxu1 }
 0x163   :  { %v404_v3 = vadd.f32 %v1488_v6, %v403_v2  ;;  %v1549_v2 = vld [vmem:[%s1643_s6] ss:$0 sm:$0xff] }
 0x165   :  { %v470_v7 = vmax.f32 %v404_v3, 0.0 }
 0x166   :  { %v243_v8 = vpop.f32.mrf.mxu0 }
 0x167   :  { %v244_v9 = vadd.f32 %v1391_v40, %v243_v8  ;;  %v497_v10 = vpack.c.bf16 %v470_v7, %v469_v4 }
 0x169   :  { %v283_v12 = vmax.f32 %v244_v9, 0.0  ;;  %605 = vmatmul.bf16.gmra.mxu2 %v497_v10 }
 0x16a   :  { %v406_v13 = vpop.f32.mrf.mxu1 }
 0x16b   :  { %v301_v14 = vpack.c.bf16 %v283_v12, %v282_v11  ;;  %v407_v16 = vadd.f32 %v1488_v6, %v406_v13 }
 0x16d   :  { %445 = vmatmul.bf16.gmra.mxu1 %v301_v14  ;;  %v471_v19 = vmax.f32 %v407_v16, 0.0 }
 0x16e   :  { %v246_v15 = vpop.f32.mrf.mxu0 }
 0x16f   :  { %v247_v20 = vadd.f32 %v1391_v40, %v246_v15 }
 0x171   :  { %v284_v25 = vmax.f32 %v247_v20, 0.0 }
 0x172   :  { %v408_v17 = vpop.f32.mrf.mxu1 }
 0x173   :  { %v409_v18 = vadd.f32 %v1488_v6, %v408_v17 }
 0x175   :  { %v472_v21 = vmax.f32 %v409_v18, 0.0 }
 0x176   :  { %v248_v22 = vpop.f32.mrf.mxu0 }
 0x177   :  { %v249_v23 = vadd.f32 %v1391_v40, %v248_v22  ;;  %v498_v24 = vpack.c.bf16 %v472_v21, %v471_v19 }
 0x179   :  { %v285_v26 = vmax.f32 %v249_v23, 0.0  ;;  %610 = vmatmul.bf16.gmra.mxu2 %v498_v24 }
 0x17a   :  { %v411_v27 = vpop.f32.mrf.mxu1 }
 0x17b   :  { %v302_v29 = vpack.c.bf16 %v285_v26, %v284_v25  ;;  %v412_v32 = vadd.f32 %v1488_v6, %v411_v27 }
 0x17d   :  { %450 = vmatmul.bf16.gmra.mxu1 %v302_v29  ;;  %v473_v36 = vmax.f32 %v412_v32, 0.0 }
 0x17e   :  { %v251_v31 = vpop.f32.mrf.mxu0 }
 0x17f   :  { %v252_v37 = vadd.f32 %v1391_v40, %v251_v31 }
 0x181   :  { %v286_v44 = vmax.f32 %v252_v37, 0.0 }
 0x182   :  { %v413_v33 = vpop.f32.mrf.mxu1 }
 0x183   :  { %v414_v35 = vadd.f32 %v1488_v6, %v413_v33 }
 0x185   :  { %v474_v38 = vmax.f32 %v414_v35, 0.0 }
 0x186   :  { %v253_v41 = vpop.f32.mrf.mxu0 }
 0x187   :  { %v254_v42 = vadd.f32 %v1391_v40, %v253_v41  ;;  %v499_v43 = vpack.c.bf16 %v474_v38, %v473_v36 }
 0x189   :  { %v287_v45 = vmax.f32 %v254_v42, 0.0  ;;  %615 = vmatmul.bf16.gmra.mxu2 %v499_v43 }
 0x18a   :  { %v416_v46 = vpop.f32.mrf.mxu1 }
 0x18b   :  { %v303_v48 = vpack.c.bf16 %v287_v45, %v286_v44  ;;  %v417_v40 = vadd.f32 %v1488_v6, %v416_v46 }
 0x18d   :  { %455 = vmatmul.bf16.gmra.mxu1 %v303_v48  ;;  %v475_v53 = vmax.f32 %v417_v40, 0.0 }
 0x192   :  { %v418_v50 = vpop.f32.mrf.mxu1 }
 0x193   :  { %v419_v52 = vadd.f32 %v1488_v6, %v418_v50 }
 0x195   :  { %v476_v54 = vmax.f32 %v419_v52, 0.0 }
 0x197   :  { %v500_v56 = vpack.c.bf16 %v476_v54, %v475_v53 }
 0x199   :  { %620 = vmatmul.bf16.gmra.mxu2 %v500_v56 }
 0x19a   :  { %v421_v57 = vpop.f32.mrf.mxu1 }
 0x19b   :  { %v422_v58 = vadd.f32 %v1488_v6, %v421_v57 }
 0x19d   :  { %v477_v61 = vmax.f32 %v422_v58, 0.0 }
 0x1a2   :  { %v423_v59 = vpop.f32.mrf.mxu1 }
 0x1a3   :  { %v424_v60 = vadd.f32 %v1488_v6, %v423_v59 }
 0x1a5   :  { %v478_v62 = vmax.f32 %v424_v60, 0.0 }
 0x1a7   :  { %v501_v63 = vpack.c.bf16 %v478_v62, %v477_v61 }
 0x1a9   :  { %625 = vmatmul.bf16.gmra.mxu2 %v501_v63 }
 0x1aa   :  { %v426_v0 = vpop.f32.mrf.mxu1 }
 0x1ab   :  { %v427_v3 = vadd.f32 %v1488_v6, %v426_v0 }
 0x1ac   :  { %v586_v1 = vpop.f32.mrf.mxu2 }
 0x1ad   :  { %v587_v5 = vadd.f32 %v1549_v2, %v586_v1  ;;  %v479_v9 = vmax.f32 %v427_v3, 0.0 }
 0x1af   :  { %v666_v12 = vmax.f32 %v587_v5, 0.0 }
 0x1b2   :  { %v428_v4 = vpop.f32.mrf.mxu1 }
 0x1b3   :  { %v429_v7 = vadd.f32 %v1488_v6, %v428_v4 }
 0x1b4   :  { %v588_v8 = vpop.f32.mrf.mxu2 }
 0x1b5   :  { %v480_v10 = vmax.f32 %v429_v7, 0.0  ;;  %v589_v11 = vadd.f32 %v1549_v2, %v588_v8 }
 0x1b7   :  { %v667_v13 = vmax.f32 %v589_v11, 0.0  ;;  %v502_v14 = vpack.c.bf16 %v480_v10, %v479_v9 }
 0x1b9   :  { %630 = vmatmul.bf16.gmra.mxu2 %v502_v14  ;;  %v698_v15 = vpack.c.bf16 %v667_v13, %v666_v12 }
 0x1ba   :  { %v431_v16 = vpop.f32.mrf.mxu1 }
 0x1bb   :  { %790 = vmatmul.bf16.vlgmr.msra.gmra.mxu3 %v698_v15  ;;  %v432_v18 = vadd.f32 %v1488_v6, %v431_v16 }
 0x1bc   :  { %v591_v17 = vpop.f32.mrf.mxu2 }
 0x1bd   :  { %v592_v20 = vadd.f32 %v1549_v2, %v591_v17  ;;  %v481_v23 = vmax.f32 %v432_v18, 0.0 }
 0x1bf   :  { %v668_v26 = vmax.f32 %v592_v20, 0.0 }
 0x1c2   :  { %v433_v19 = vpop.f32.mrf.mxu1 }
 0x1c3   :  { %v434_v21 = vadd.f32 %v1488_v6, %v433_v19 }
 0x1c4   :  { %v593_v22 = vpop.f32.mrf.mxu2 }
 0x1c5   :  { %v482_v24 = vmax.f32 %v434_v21, 0.0  ;;  %v594_v25 = vadd.f32 %v1549_v2, %v593_v22 }
 0x1c7   :  { %v669_v27 = vmax.f32 %v594_v25, 0.0  ;;  %v503_v28 = vpack.c.bf16 %v482_v24, %v481_v23 }
 0x1c9   :  { %635 = vmatmul.bf16.gmra.mxu2 %v503_v28  ;;  %v699_v29 = vpack.c.bf16 %v669_v27, %v668_v26 }
 0x1ca   :  { %v436_v30 = vpop.f32.mrf.mxu1 }
 0x1cb   :  { %795 = vmatmul.bf16.gmra.mxu3 %v699_v29  ;;  %v437_v32 = vadd.f32 %v1488_v6, %v436_v30 }
 0x1cc   :  { %v596_v31 = vpop.f32.mrf.mxu2 }
 0x1cd   :  { %v597_v34 = vadd.f32 %v1549_v2, %v596_v31  ;;  %v483_v37 = vmax.f32 %v437_v32, 0.0 }
 0x1cf   :  { %v670_v41 = vmax.f32 %v597_v34, 0.0 }
 0x1d2   :  { %v438_v33 = vpop.f32.mrf.mxu1 }
 0x1d3   :  { %v439_v35 = vadd.f32 %v1488_v6, %v438_v33 }
 0x1d4   :  { %v598_v36 = vpop.f32.mrf.mxu2 }
 0x1d5   :  { %v484_v38 = vmax.f32 %v439_v35, 0.0  ;;  %v599_v39 = vadd.f32 %v1549_v2, %v598_v36 }
 0x1d7   :  { %v671_v42 = vmax.f32 %v599_v39, 0.0  ;;  %v504_v43 = vpack.c.bf16 %v484_v38, %v483_v37 }
 0x1d9   :  { %640 = vmatmul.bf16.gmra.mxu2 %v504_v43  ;;  %v700_v44 = vpack.c.bf16 %v671_v42, %v670_v41 }
 0x1da   :  { %v441_v45 = vpop.f32.mrf.mxu1 }
 0x1db   :  { %800 = vmatmul.bf16.gmra.mxu3 %v700_v44  ;;  %v442_v47 = vadd.f32 %v1488_v6, %v441_v45 }
 0x1dc   :  { %v601_v46 = vpop.f32.mrf.mxu2 }
 0x1dd   :  { %v602_v49 = vadd.f32 %v1549_v2, %v601_v46  ;;  %v485_v51 = vmax.f32 %v442_v47, 0.0 }
 0x1df   :  { %v672_v54 = vmax.f32 %v602_v49, 0.0 }
 0x1e2   :  { %v443_v48 = vpop.f32.mrf.mxu1 }
 0x1e3   :  { %v444_v40 = vadd.f32 %v1488_v6, %v443_v48 }
 0x1e4   :  { %v603_v50 = vpop.f32.mrf.mxu2 }
 0x1e5   :  { %v486_v52 = vmax.f32 %v444_v40, 0.0  ;;  %v604_v53 = vadd.f32 %v1549_v2, %v603_v50 }
 0x1e7   :  { %v505_v55 = vpack.c.bf16 %v486_v52, %v485_v51  ;;  %v673_v56 = vmax.f32 %v604_v53, 0.0 }
 0x1e9   :  { %645 = vmatmul.bf16.gmra.mxu2 %v505_v55  ;;  %v701_v57 = vpack.c.bf16 %v673_v56, %v672_v54  ;;  %v1587_v54 = vld [vmem:[%s1645_s8] ss:$0 sm:$0xff]  ;;  %s1237_s8 = smov [#allocation2]  }
 0x1ea   :  { %v446_v58 = vpop.f32.mrf.mxu1  ;;  %s939_s16 = sshll.u32 %s1237_s8, 4  ;;  %s940_s16 = int_to_ptr.vmem [resolvable:$true] %s939_s16 }
 0x1eb   :  { %805 = vmatmul.bf16.gmra.mxu3 %v701_v57  ;;  %v447_v60 = vadd.f32 %v1488_v6, %v446_v58 }
 0x1ec   :  { %v606_v59 = vpop.f32.mrf.mxu2 }
 0x1ed   :  { %v607_v62 = vadd.f32 %v1549_v2, %v606_v59  ;;  %v487_v1 = vmax.f32 %v447_v60, 0.0 }
 0x1ef   :  { %v674_v5 = vmax.f32 %v607_v62, 0.0 }
 0x1f2   :  { %v448_v61 = vpop.f32.mrf.mxu1 }
 0x1f3   :  { %v449_v63 = vadd.f32 %v1488_v6, %v448_v61 }
 0x1f4   :  { %v608_v0 = vpop.f32.mrf.mxu2 }
 0x1f5   :  { %v488_v3 = vmax.f32 %v449_v63, 0.0  ;;  %v609_v4 = vadd.f32 %v1549_v2, %v608_v0 }
 0x1f7   :  { %v506_v7 = vpack.c.bf16 %v488_v3, %v487_v1  ;;  %v675_v8 = vmax.f32 %v609_v4, 0.0 }
 0x1f9   :  { %650 = vmatmul.bf16.gmra.mxu2 %v506_v7  ;;  %v702_v9 = vpack.c.bf16 %v675_v8, %v674_v5 }
 0x1fa   :  { %v451_v10 = vpop.f32.mrf.mxu1 }
 0x1fb   :  { %810 = vmatmul.bf16.gmra.mxu3 %v702_v9  ;;  %v452_v12 = vadd.f32 %v1488_v6, %v451_v10 }
 0x1fc   :  { %v611_v11 = vpop.f32.mrf.mxu2 }
 0x1fd   :  { %v612_v14 = vadd.f32 %v1549_v2, %v611_v11  ;;  %v489_v17 = vmax.f32 %v452_v12, 0.0 }
 0x1ff   :  { %v676_v20 = vmax.f32 %v612_v14, 0.0 }
 0x202   :  { %v453_v13 = vpop.f32.mrf.mxu1 }
 0x203   :  { %v454_v15 = vadd.f32 %v1488_v6, %v453_v13 }
 0x204   :  { %v613_v16 = vpop.f32.mrf.mxu2 }
 0x205   :  { %v490_v18 = vmax.f32 %v454_v15, 0.0  ;;  %v614_v19 = vadd.f32 %v1549_v2, %v613_v16 }
 0x207   :  { %v507_v21 = vpack.c.bf16 %v490_v18, %v489_v17  ;;  %v677_v22 = vmax.f32 %v614_v19, 0.0 }
 0x209   :  { %655 = vmatmul.bf16.gmra.mxu2 %v507_v21  ;;  %v703_v23 = vpack.c.bf16 %v677_v22, %v676_v20 }
 0x20a   :  { %v456_v24 = vpop.f32.mrf.mxu1 }
 0x20b   :  { %815 = vmatmul.bf16.gmra.mxu3 %v703_v23  ;;  %v457_v26 = vadd.f32 %v1488_v6, %v456_v24 }
 0x20c   :  { %v616_v25 = vpop.f32.mrf.mxu2 }
 0x20d   :  { %v617_v28 = vadd.f32 %v1549_v2, %v616_v25  ;;  %v491_v31 = vmax.f32 %v457_v26, 0.0 }
 0x20f   :  { %v678_v34 = vmax.f32 %v617_v28, 0.0 }
 0x212   :  { %v458_v27 = vpop.f32.mrf.mxu1 }
 0x213   :  { %v459_v29 = vadd.f32 %v1488_v6, %v458_v27 }
 0x214   :  { %v618_v30 = vpop.f32.mrf.mxu2 }
 0x215   :  { %v492_v32 = vmax.f32 %v459_v29, 0.0  ;;  %v619_v33 = vadd.f32 %v1549_v2, %v618_v30 }
 0x217   :  { %v508_v35 = vpack.c.bf16 %v492_v32, %v491_v31  ;;  %v679_v36 = vmax.f32 %v619_v33, 0.0 }
 0x219   :  { %660 = vmatmul.bf16.gmra.mxu2 %v508_v35  ;;  %v704_v37 = vpack.c.bf16 %v679_v36, %v678_v34 }
 0x21b   :  { %820 = vmatmul.bf16.gmra.mxu3 %v704_v37 }
 0x21c   :  { %v621_v38 = vpop.f32.mrf.mxu2 }
 0x21d   :  { %v622_v39 = vadd.f32 %v1549_v2, %v621_v38 }
 0x21f   :  { %v680_v43 = vmax.f32 %v622_v39, 0.0 }
 0x224   :  { %v623_v41 = vpop.f32.mrf.mxu2 }
 0x225   :  { %v624_v42 = vadd.f32 %v1549_v2, %v623_v41 }
 0x227   :  { %v681_v44 = vmax.f32 %v624_v42, 0.0 }
 0x229   :  { %v705_v6 = vpack.c.bf16 %v681_v44, %v680_v43 }
 0x22b   :  { %825 = vmatmul.bf16.gmra.mxu3 %v705_v6 }
 0x22c   :  { %v626_v45 = vpop.f32.mrf.mxu2 }
 0x22d   :  { %v627_v46 = vadd.f32 %v1549_v2, %v626_v45 }
 0x22f   :  { %v682_v49 = vmax.f32 %v627_v46, 0.0 }
 0x234   :  { %v628_v47 = vpop.f32.mrf.mxu2 }
 0x235   :  { %v629_v48 = vadd.f32 %v1549_v2, %v628_v47 }
 0x237   :  { %v683_v40 = vmax.f32 %v629_v48, 0.0 }
 0x239   :  { %v706_v50 = vpack.c.bf16 %v683_v40, %v682_v49 }
 0x23b   :  { %830 = vmatmul.bf16.gmra.mxu3 %v706_v50 }
 0x23c   :  { %v631_v51 = vpop.f32.mrf.mxu2 }
 0x23d   :  { %v632_v53 = vadd.f32 %v1549_v2, %v631_v51 }
 0x23e   :  { %v791_v52 = vpop.f32.mrf.mxu3 }
 0x23f   :  { %v684_v58 = vmax.f32 %v632_v53, 0.0  ;;  %v792_v59 = vadd.f32 %v1587_v54, %v791_v52 }
 0x244   :  { %v633_v55 = vpop.f32.mrf.mxu2 }
 0x245   :  { %v634_v56 = vadd.f32 %v1549_v2, %v633_v55 }
 0x246   :  { %v793_v57 = vpop.f32.mrf.mxu3 }
 0x247   :  { %v685_v60 = vmax.f32 %v634_v56, 0.0  ;;  %v794_v61 = vadd.f32 %v1587_v54, %v793_v57 }
 0x249   :  { %v1112_v62 = vpack.c.bf16 %v794_v61, %v792_v59  ;;  %v707_v63 = vpack.c.bf16 %v685_v60, %v684_v58 }
 0x24b   :  { %1113 = vst [vmem:[#allocation2] sm:$0xff] %v1112_v62   ;;  %835 = vmatmul.bf16.gmra.mxu3 %v707_v63 }
 0x24c   :  { %v636_v0 = vpop.f32.mrf.mxu2 }
 0x24d   :  { %v637_v3 = vadd.f32 %v1549_v2, %v636_v0 }
 0x24e   :  { %v796_v1 = vpop.f32.mrf.mxu3 }
 0x24f   :  { %v686_v8 = vmax.f32 %v637_v3, 0.0  ;;  %v797_v9 = vadd.f32 %v1587_v54, %v796_v1 }
 0x254   :  { %v638_v4 = vpop.f32.mrf.mxu2 }
 0x255   :  { %v639_v5 = vadd.f32 %v1549_v2, %v638_v4 }
 0x256   :  { %v798_v7 = vpop.f32.mrf.mxu3 }
 0x257   :  { %v687_v10 = vmax.f32 %v639_v5, 0.0  ;;  %v799_v11 = vadd.f32 %v1587_v54, %v798_v7 }
 0x259   :  { %v1117_v12 = vpack.c.bf16 %v799_v11, %v797_v9  ;;  %v708_v13 = vpack.c.bf16 %v687_v10, %v686_v8 }
 0x25b   :  { %1189 = vst [vmem:[#allocation2 + $0x8] sm:$0xff] %v1117_v12   ;;  %840 = vmatmul.bf16.gmra.mxu3 %v708_v13 }
 0x25c   :  { %v641_v14 = vpop.f32.mrf.mxu2 }
 0x25d   :  { %v642_v16 = vadd.f32 %v1549_v2, %v641_v14 }
 0x25e   :  { %v801_v15 = vpop.f32.mrf.mxu3 }
 0x25f   :  { %v688_v20 = vmax.f32 %v642_v16, 0.0  ;;  %v802_v21 = vadd.f32 %v1587_v54, %v801_v15 }
 0x264   :  { %v643_v17 = vpop.f32.mrf.mxu2 }
 0x265   :  { %v644_v18 = vadd.f32 %v1549_v2, %v643_v17 }
 0x266   :  { %v803_v19 = vpop.f32.mrf.mxu3 }
 0x267   :  { %v689_v22 = vmax.f32 %v644_v18, 0.0  ;;  %v804_v23 = vadd.f32 %v1587_v54, %v803_v19 }
 0x269   :  { %v1122_v24 = vpack.c.bf16 %v804_v23, %v802_v21  ;;  %v709_v25 = vpack.c.bf16 %v689_v22, %v688_v20 }
 0x26b   :  { %1190 = vst [vmem:[#allocation2 + $0x10] sm:$0xff] %v1122_v24   ;;  %845 = vmatmul.bf16.gmra.mxu3 %v709_v25 }
 0x26c   :  { %v646_v26 = vpop.f32.mrf.mxu2 }
 0x26d   :  { %v647_v28 = vadd.f32 %v1549_v2, %v646_v26 }
 0x26e   :  { %v806_v27 = vpop.f32.mrf.mxu3 }
 0x26f   :  { %v690_v32 = vmax.f32 %v647_v28, 0.0  ;;  %v807_v33 = vadd.f32 %v1587_v54, %v806_v27 }
 0x274   :  { %v648_v29 = vpop.f32.mrf.mxu2 }
 0x275   :  { %v649_v30 = vadd.f32 %v1549_v2, %v648_v29 }
 0x276   :  { %v808_v31 = vpop.f32.mrf.mxu3 }
 0x277   :  { %v691_v34 = vmax.f32 %v649_v30, 0.0  ;;  %v809_v35 = vadd.f32 %v1587_v54, %v808_v31 }
 0x279   :  { %v710_v36 = vpack.c.bf16 %v691_v34, %v690_v32  ;;  %v1127_v37 = vpack.c.bf16 %v809_v35, %v807_v33 }
 0x27b   :  { %1191 = vst [vmem:[#allocation2 + $0x18] sm:$0xff] %v1127_v37   ;;  %850 = vmatmul.bf16.gmra.mxu3 %v710_v36 }
 0x27c   :  { %v651_v38 = vpop.f32.mrf.mxu2 }
 0x27d   :  { %v652_v41 = vadd.f32 %v1549_v2, %v651_v38 }
 0x27e   :  { %v811_v39 = vpop.f32.mrf.mxu3 }
 0x27f   :  { %v692_v6 = vmax.f32 %v652_v41, 0.0  ;;  %v812_v45 = vadd.f32 %v1587_v54, %v811_v39 }
 0x284   :  { %v653_v42 = vpop.f32.mrf.mxu2 }
 0x285   :  { %v654_v43 = vadd.f32 %v1549_v2, %v653_v42 }
 0x286   :  { %v813_v44 = vpop.f32.mrf.mxu3 }
 0x287   :  { %v693_v46 = vmax.f32 %v654_v43, 0.0  ;;  %v814_v47 = vadd.f32 %v1587_v54, %v813_v44 }
 0x289   :  { %v711_v48 = vpack.c.bf16 %v693_v46, %v692_v6  ;;  %v1132_v49 = vpack.c.bf16 %v814_v47, %v812_v45 }
 0x28b   :  { %1192 = vst [vmem:[#allocation2 + $0x20] sm:$0xff] %v1132_v49   ;;  %855 = vmatmul.bf16.gmra.mxu3 %v711_v48 }
 0x28c   :  { %v656_v40 = vpop.f32.mrf.mxu2 }
 0x28d   :  { %v657_v51 = vadd.f32 %v1549_v2, %v656_v40 }
 0x28e   :  { %v816_v50 = vpop.f32.mrf.mxu3 }
 0x28f   :  { %v694_v56 = vmax.f32 %v657_v51, 0.0  ;;  %v817_v57 = vadd.f32 %v1587_v54, %v816_v50 }
 0x294   :  { %v658_v52 = vpop.f32.mrf.mxu2 }
 0x295   :  { %v659_v53 = vadd.f32 %v1549_v2, %v658_v52 }
 0x296   :  { %v818_v55 = vpop.f32.mrf.mxu3 }
 0x297   :  { %v695_v58 = vmax.f32 %v659_v53, 0.0  ;;  %v819_v59 = vadd.f32 %v1587_v54, %v818_v55 }
 0x299   :  { %v712_v60 = vpack.c.bf16 %v695_v58, %v694_v56  ;;  %v1137_v61 = vpack.c.bf16 %v819_v59, %v817_v57 }
 0x29b   :  { %1193 = vst [vmem:[#allocation2 + $0x28] sm:$0xff] %v1137_v61   ;;  %860 = vmatmul.bf16.gmra.mxu3 %v712_v60 }
 0x29c   :  { %v661_v62 = vpop.f32.mrf.mxu2 }
 0x29d   :  { %v662_v0 = vadd.f32 %v1549_v2, %v661_v62 }
 0x29e   :  { %v821_v63 = vpop.f32.mrf.mxu3 }
 0x29f   :  { %v696_v5 = vmax.f32 %v662_v0, 0.0  ;;  %v822_v7 = vadd.f32 %v1587_v54, %v821_v63 }
 0x2a4   :  { %v663_v1 = vpop.f32.mrf.mxu2 }
 0x2a5   :  { %v664_v3 = vadd.f32 %v1549_v2, %v663_v1 }
 0x2a6   :  { %v823_v4 = vpop.f32.mrf.mxu3 }
 0x2a7   :  { %v697_v8 = vmax.f32 %v664_v3, 0.0  ;;  %v824_v9 = vadd.f32 %v1587_v54, %v823_v4 }
 0x2a9   :  { %v713_v10 = vpack.c.bf16 %v697_v8, %v696_v5  ;;  %v1142_v11 = vpack.c.bf16 %v824_v9, %v822_v7 }
 0x2ab   :  { %1194 = vst [vmem:[#allocation2 + $0x30] sm:$0xff] %v1142_v11   ;;  %865 = vmatmul.bf16.gmra.mxu3 %v713_v10 }
 0x2ae   :  { %v826_v12 = vpop.f32.mrf.mxu3 }
 0x2af   :  { %v827_v14 = vadd.f32 %v1587_v54, %v826_v12 }
 0x2b6   :  { %v828_v13 = vpop.f32.mrf.mxu3 }
 0x2b7   :  { %v829_v15 = vadd.f32 %v1587_v54, %v828_v13 }
 0x2b9   :  { %v1147_v16 = vpack.c.bf16 %v829_v15, %v827_v14 }
 0x2bb   :  { %1195 = vst [vmem:[#allocation2 + $0x38] sm:$0xff] %v1147_v16  }
 0x2be   :  { %v831_v2 = vpop.f32.mrf.mxu3 }
 0x2bf   :  { %v832_v18 = vadd.f32 %v1587_v54, %v831_v2 }
 0x2c6   :  { %v833_v17 = vpop.f32.mrf.mxu3 }
 0x2c7   :  { %v834_v19 = vadd.f32 %v1587_v54, %v833_v17 }
 0x2c9   :  { %v1152_v20 = vpack.c.bf16 %v834_v19, %v832_v18 }
 0x2cb   :  { %1196 = vst [vmem:[#allocation2 + $0x40] sm:$0xff] %v1152_v20  }
 0x2ce   :  { %v836_v21 = vpop.f32.mrf.mxu3 }
 0x2cf   :  { %v837_v23 = vadd.f32 %v1587_v54, %v836_v21 }
 0x2d6   :  { %v838_v22 = vpop.f32.mrf.mxu3 }
 0x2d7   :  { %v839_v24 = vadd.f32 %v1587_v54, %v838_v22 }
 0x2d9   :  { %v1157_v25 = vpack.c.bf16 %v839_v24, %v837_v23 }
 0x2db   :  { %1197 = vst [vmem:[#allocation2 + $0x48] sm:$0xff] %v1157_v25  }
 0x2de   :  { %v841_v26 = vpop.f32.mrf.mxu3 }
 0x2df   :  { %v842_v28 = vadd.f32 %v1587_v54, %v841_v26 }
 0x2e6   :  { %v843_v27 = vpop.f32.mrf.mxu3 }
 0x2e7   :  { %v844_v29 = vadd.f32 %v1587_v54, %v843_v27 }
 0x2e9   :  { %v1162_v30 = vpack.c.bf16 %v844_v29, %v842_v28 }
 0x2eb   :  { %1198 = vst [vmem:[#allocation2 + $0x50] sm:$0xff] %v1162_v30  }
 0x2ee   :  { %v846_v31 = vpop.f32.mrf.mxu3 }
 0x2ef   :  { %v847_v33 = vadd.f32 %v1587_v54, %v846_v31 }
 0x2f6   :  { %v848_v32 = vpop.f32.mrf.mxu3 }
 0x2f7   :  { %v849_v34 = vadd.f32 %v1587_v54, %v848_v32 }
 0x2f9   :  { %v1167_v35 = vpack.c.bf16 %v849_v34, %v847_v33 }
 0x2fb   :  { %1199 = vst [vmem:[#allocation2 + $0x58] sm:$0xff] %v1167_v35  }
 0x2fe   :  { %v851_v36 = vpop.f32.mrf.mxu3 }
 0x2ff   :  { %v852_v38 = vadd.f32 %v1587_v54, %v851_v36 }
 0x306   :  { %v853_v37 = vpop.f32.mrf.mxu3 }
 0x307   :  { %v854_v39 = vadd.f32 %v1587_v54, %v853_v37 }
 0x309   :  { %v1172_v41 = vpack.c.bf16 %v854_v39, %v852_v38 }
 0x30b   :  { %1200 = vst [vmem:[#allocation2 + $0x60] sm:$0xff] %v1172_v41  }
 0x30e   :  { %v856_v42 = vpop.f32.mrf.mxu3 }
 0x30f   :  { %v857_v44 = vadd.f32 %v1587_v54, %v856_v42 }
 0x316   :  { %v858_v43 = vpop.f32.mrf.mxu3 }
 0x317   :  { %v859_v6 = vadd.f32 %v1587_v54, %v858_v43 }
 0x319   :  { %v1177_v45 = vpack.c.bf16 %v859_v6, %v857_v44 }
 0x31b   :  { %1201 = vst [vmem:[#allocation2 + $0x68] sm:$0xff] %v1177_v45  }
 0x31e   :  { %v861_v46 = vpop.f32.mrf.mxu3 }
 0x31f   :  { %v862_v48 = vadd.f32 %v1587_v54, %v861_v46 }
 0x326   :  { %v863_v47 = vpop.f32.mrf.mxu3 }
 0x327   :  { %v864_v49 = vadd.f32 %v1587_v54, %v863_v47 }
 0x329   :  { %v1182_v40 = vpack.c.bf16 %v864_v49, %v862_v48 }
 0x32b   :  { %1202 = vst [vmem:[#allocation2 + $0x70] sm:$0xff] %v1182_v40  }
 0x32e   :  { %v866_v50 = vpop.f32.mrf.mxu3 }
 0x32f   :  { %v867_v52 = vadd.f32 %v1587_v54, %v866_v50 }
 0x336   :  { %v868_v51 = vpop.f32.mrf.mxu3 }
 0x337   :  { %v869_v53 = vadd.f32 %v1587_v54, %v868_v51 }
 0x339   :  { %v1187_v55 = vpack.c.bf16 %v869_v53, %v867_v52 }
 0x33b   :  { %1203 = vst [vmem:[#allocation2 + $0x78] sm:$0xff] %v1187_v55  }
 0x33c   :  { %947 = dma.vmem_to_hbm [thread:$0]  %s940_s16, 2048, %s942_s19, [#allocation3], %s1238_s20, %s1238_s20, %s1239_s21  }
 0x33d   :  { %1235 = dma.done.wait [#allocation3], 2048  }
 0x33e   :  { %1236 = vsyncadd [#allocation3], 4294965248 }
 0x33f   :  { %952 = vsyncpa [#allocation3], 1 }

</bundles_post_ra>
